<compile_context>
chip_gen: v5e
topology: v5e:2x2
jax: 0.10.0
libtpu: 0.0.40
codegen_flags: <defaults>
</compile_context>

<pallas_src>
import jax
import jax.numpy as jnp
from jax.experimental import pallas as pl
from jax.experimental.pallas import tpu as pltpu


def _round_up(x, m):
    return (x + m - 1) // m * m


def mlp_kernel(x_ref, w1_ref, b1_ref, w2_ref, b2_ref, o_ref):
    # Hidden layer: Linear(F -> H) + Sigmoid
    x = x_ref[...]                                        # [TB, Fp]
    h = jnp.dot(x, w1_ref[...],
                preferred_element_type=jnp.float32)       # [TB, Hp]  (MXU)
    h = h + b1_ref[...]                                   # broadcast [1, Hp]
    # Sigmoid: exp on the EUP, exact divide on the VPU.
    # NOTE: pl.reciprocal(1.0 + jnp.exp(-h), approx=True) would push the
    # divide onto the EUP too, at ~2^-12 relative error.
    h = 1.0 / (1.0 + jnp.exp(-h))                         # [TB, Hp]
    # Output layer: Linear(H -> 1) as VPU multiply + lane reduction
    # (an N=1 MXU matmul would use <1% of the MXU and pay full drain latency).
    y = jnp.sum(h * w2_ref[...], axis=-1, keepdims=True)  # [TB, 1]
    o_ref[...] = y + b2_ref[0, 0]                         # scalar bias from SMEM


def net_forward(x, w1, b1, w2, b2):
    B, F = x.shape
    H = w1.shape[1]                       # 2 * F

    # MXU/lane-aligned padding (item: make the matmul MXU-shaped).
    Fp = _round_up(F, 128)
    Hp = _round_up(H, 128)
    TB = min(512, _round_up(B, 128))      # batch tile (multiple of 128)
    Bp = _round_up(B, TB)

    x_p = jnp.zeros((Bp, Fp), jnp.float32).at[:B, :F].set(x)
    w1_p = jnp.zeros((Fp, Hp), jnp.float32).at[:F, :H].set(w1)
    b1_p = jnp.zeros((1, Hp), jnp.float32).at[0, :H].set(b1)
    # w2 as a lane-major row [1, Hp]; padded hidden lanes are zero.
    w2_p = jnp.zeros((1, Hp), jnp.float32).at[0, :H].set(w2.reshape(-1))
    b2_p = b2.reshape(1, 1).astype(jnp.float32)

    grid = (Bp // TB,)
    cost = pl.CostEstimate(
        flops=2 * Bp * Fp * Hp + 2 * Bp * Hp,
        transcendentals=Bp * Hp,
        bytes_accessed=4 * (Bp * Fp + Fp * Hp + Hp + Hp + Bp),
    )

    out = pl.pallas_call(
        mlp_kernel,
        out_shape=jax.ShapeDtypeStruct((Bp, 1), jnp.float32),
        grid=grid,
        in_specs=[
            pl.BlockSpec((TB, Fp), lambda i: (i, 0)),   # x tile (pipelined)
            pl.BlockSpec((Fp, Hp), lambda i: (0, 0)),   # w1 (resident)
            pl.BlockSpec((1, Hp), lambda i: (0, 0)),    # b1 (resident)
            pl.BlockSpec((1, Hp), lambda i: (0, 0)),    # w2 row (resident)
            pl.BlockSpec(memory_space=pltpu.MemorySpace.SMEM),  # b2 scalar
        ],
        out_specs=pl.BlockSpec((TB, 1), lambda i: (i, 0)),
        compiler_params=pltpu.CompilerParams(
            dimension_semantics=("parallel",),           # shards over v7x's 2 TCs
            vmem_limit_bytes=48 * 1024 * 1024,           # headroom below v7x's 64 MiB
        ),
        cost_estimate=cost,
    )(x_p, w1_p, b1_p, w2_p, b2_p)

    return out[:B]


def init_params(key, num_feats):
    """Deterministic init mimicking nn.Linear's U(-1/sqrt(fan_in), 1/sqrt(fan_in))."""
    k1, k2, k3, k4 = jax.random.split(key, 4)
    hidden = 2 * num_feats
    lim1 = 1.0 / jnp.sqrt(num_feats)
    lim2 = 1.0 / jnp.sqrt(hidden)
    # Stored as [in, out] (transposed relative to PyTorch's [out, in]).
    w1 = jax.random.uniform(k1, (num_feats, hidden), jnp.float32, -lim1, lim1)
    b1 = jax.random.uniform(k2, (hidden,), jnp.float32, -lim1, lim1)
    w2 = jax.random.uniform(k3, (hidden, 1), jnp.float32, -lim2, lim2)
    b2 = jax.random.uniform(k4, (1,), jnp.float32, -lim2, lim2)
    return w1, b1, w2, b2


def reference_forward(x, w1, b1, w2, b2):
    h = jax.nn.sigmoid(x @ w1 + b1)
    return h @ w2 + b2


if __name__ == "__main__":
    num_feats = 32
    batch = 8

    key = jax.random.PRNGKey(0)
    kx, kp = jax.random.split(key)
    x = jax.random.normal(kx, (batch, num_feats), jnp.float32)
    w1, b1, w2, b2 = init_params(kp, num_feats)

    y = net_forward(x, w1, b1, w2, b2)
    jax.block_until_ready(y)

    y_ref = reference_forward(x, w1, b1, w2, b2)
    assert y.shape == (batch, 1), y.shape
    assert jnp.allclose(y, y_ref, atol=1e-4, rtol=1e-4), (y, y_ref)

    print("KERNEL_OK")
</pallas_src>

<mosaic_0001>
module attributes {stable_mosaic.version = 11 : i64} {
  func.func @mlp_kernel(%arg0: i32, %arg1: memref<128x128xf32, #tpu.memory_space<vmem>>, %arg2: memref<128x128xf32, #tpu.memory_space<vmem>>, %arg3: memref<1x128xf32, #tpu.memory_space<vmem>>, %arg4: memref<1x128xf32, #tpu.memory_space<vmem>>, %arg5: memref<1x1xf32, #tpu.memory_space<smem>>, %arg6: memref<128x1xf32, #tpu.memory_space<vmem>>) attributes {dimension_semantics = [#tpu.dimension_semantics<parallel>], iteration_bounds = array<i64: 1>, scalar_prefetch = 0 : i64, scratch_operands = 0 : i64, tpu.core_type = #tpu.core_type<tc>, window_params = [{transform_indices = @transform_0, window_bounds = array<i64: 128, 128>}, {pipeline_mode = #tpu.pipeline_mode<synchronous>, transform_indices = @transform_1, window_bounds = array<i64: 128, 128>}, {pipeline_mode = #tpu.pipeline_mode<synchronous>, transform_indices = @transform_2, window_bounds = array<i64: 1, 128>}, {pipeline_mode = #tpu.pipeline_mode<synchronous>, transform_indices = @transform_3, window_bounds = array<i64: 1, 128>}, {transform_indices = @transform_4, window_bounds = array<i64: 1, 1>}, {transform_indices = @transform_5, window_bounds = array<i64: 128, 1>}]} {
    %c0 = arith.constant 0 : index
    %c0_0 = arith.constant 0 : index
    %0 = vector.load %arg1[%c0, %c0_0] : memref<128x128xf32, #tpu.memory_space<vmem>>, vector<128x128xf32>
    %c0_1 = arith.constant 0 : index
    %c0_2 = arith.constant 0 : index
    %1 = vector.load %arg2[%c0_1, %c0_2] : memref<128x128xf32, #tpu.memory_space<vmem>>, vector<128x128xf32>
    %cst = arith.constant dense<0.000000e+00> : vector<128x128xf32>
    %2 = tpu.matmul %0, %1, %cst {dimension_numbers = #tpu.dot_dimension_numbers<[1], [0], [0], [1], [0, 0, 1, 1], [], []>} : vector<128x128xf32>, vector<128x128xf32>, vector<128x128xf32> -> vector<128x128xf32>
    %c0_3 = arith.constant 0 : index
    %c0_4 = arith.constant 0 : index
    %3 = vector.load %arg3[%c0_3, %c0_4] : memref<1x128xf32, #tpu.memory_space<vmem>>, vector<1x128xf32>
    %4 = vector.broadcast %3 : vector<1x128xf32> to vector<128x128xf32>
    %5 = arith.addf %2, %4 : vector<128x128xf32>
    %cst_5 = arith.constant 0.000000e+00 : f32
    %6 = vector.broadcast %cst_5 : f32 to vector<128x128xf32>
    %7 = arith.subf %6, %5 : vector<128x128xf32>
    %8 = math.exp %7 : vector<128x128xf32>
    %cst_6 = arith.constant 1.000000e+00 : f32
    %9 = vector.broadcast %cst_6 : f32 to vector<128x128xf32>
    %10 = arith.addf %9, %8 : vector<128x128xf32>
    %cst_7 = arith.constant 1.000000e+00 : f32
    %11 = vector.broadcast %cst_7 : f32 to vector<128x128xf32>
    %12 = arith.divf %11, %10 : vector<128x128xf32>
    %c0_8 = arith.constant 0 : index
    %c0_9 = arith.constant 0 : index
    %13 = vector.load %arg4[%c0_8, %c0_9] : memref<1x128xf32, #tpu.memory_space<vmem>>, vector<1x128xf32>
    %14 = vector.broadcast %13 : vector<1x128xf32> to vector<128x128xf32>
    %15 = arith.mulf %12, %14 : vector<128x128xf32>
    %cst_10 = arith.constant dense<0.000000e+00> : vector<128xf32>
    %16 = vector.multi_reduction <add>, %15, %cst_10 [1] : vector<128x128xf32> to vector<128xf32>
    %17 = vector.shape_cast %16 : vector<128xf32> to vector<128x1xf32>
    %c0_11 = arith.constant 0 : index
    %c0_12 = arith.constant 0 : index
    %18 = memref.load %arg5[%c0_11, %c0_12] : memref<1x1xf32, #tpu.memory_space<smem>>
    %19 = vector.broadcast %18 : f32 to vector<128x1xf32>
    %20 = arith.addf %17, %19 : vector<128x1xf32>
    %c0_13 = arith.constant 0 : index
    %c0_14 = arith.constant 0 : index
    %21 = vector.load %arg6[%c0_13, %c0_14] : memref<128x1xf32, #tpu.memory_space<vmem>>, vector<128x1xf32>
    tpu.vector_store %arg6[%c0_13, %c0_14], %20 {strides = array<i32>} : memref<128x1xf32, #tpu.memory_space<vmem>>, vector<128x1xf32>,
    return
  }
  func.func @transform_0(%arg0: i32) -> (i32, i32) {
    %c0_i32 = arith.constant 0 : i32
    %c0_i32_0 = arith.constant 0 : i32
    return %arg0, %c0_i32 : i32, i32
  }
  func.func @transform_1(%arg0: i32) -> (i32, i32) {
    %c0_i32 = arith.constant 0 : i32
    %c0_i32_0 = arith.constant 0 : i32
    %c0_i32_1 = arith.constant 0 : i32
    return %c0_i32, %c0_i32_0 : i32, i32
  }
  func.func @transform_2(%arg0: i32) -> (i32, i32) {
    %c0_i32 = arith.constant 0 : i32
    %c0_i32_0 = arith.constant 0 : i32
    %c0_i32_1 = arith.constant 0 : i32
    return %c0_i32, %c0_i32_0 : i32, i32
  }
  func.func @transform_3(%arg0: i32) -> (i32, i32) {
    %c0_i32 = arith.constant 0 : i32
    %c0_i32_0 = arith.constant 0 : i32
    %c0_i32_1 = arith.constant 0 : i32
    return %c0_i32, %c0_i32_0 : i32, i32
  }
  func.func @transform_4(%arg0: i32) -> (i32, i32) {
    %c0_i32 = arith.constant 0 : i32
    %c0_i32_0 = arith.constant 0 : i32
    %c0_i32_1 = arith.constant 0 : i32
    return %c0_i32, %c0_i32_0 : i32, i32
  }
  func.func @transform_5(%arg0: i32) -> (i32, i32) {
    %c0_i32 = arith.constant 0 : i32
    %c0_i32_0 = arith.constant 0 : i32
    return %arg0, %c0_i32 : i32, i32
  }
}

</mosaic_0001>

<bundles_post_ra>
// kernel: tpu_custom_call.1
= control target key start
LH: loop header
LB: loop body
LE: loop exit
PB: predicated region body
PF: predicated region fallthrough
CT: control target
= control target key end

     0   :  { %11 = vsyncpa [#allocation4], 0  ;;  %s1274_s0 = inlined_call_operand.hbm [shape: f32[128,128], index: 0, kind: input, shape index: {}]   ;;  %s1275_s1 = inlined_call_operand.hbm [shape: f32[128,128], index: 1, kind: input, shape index: {}]   ;;  %s1276_s2 = inlined_call_operand.vmem [shape: f32[1,128], index: 2, kind: input, shape index: {}]   ;;  %s1277_s3 = inlined_call_operand.vmem [shape: f32[1,128], index: 3, kind: input, shape index: {}]   ;;  %s1278_s4 = inlined_call_operand.<no memory space> [shape: f32[1,1], index: 4, kind: input, shape index: {}]   ;;  %s1279_s5 = inlined_call_operand.vmem [shape: f32[128,1], index: 5, kind: output, shape index: {}]  }
   0x1   :  { %s17_s20 = sshll.u32 %s1274_s0, 4  ;;  %s18_s20 = int_to_ptr.hbm [resolvable:$true] %s17_s20 }
   0x2   :  { %12 = vsyncpa [#allocation6], 0  ;;  %s721_s21 = smov [#allocation3]   ;;  %s30_s25 = sshll.u32 %s1275_s1, 4  ;;  %s31_s25 = int_to_ptr.hbm [resolvable:$true] %s30_s25 }
   0x3   :  { %s19_s22 = sshll.u32 %s721_s21, 4  ;;  %s722_s26 = smov 128   ;;  %s20_s22 = int_to_ptr.vmem [resolvable:$true] %s19_s22 }
   0x4   :  { %s723_s27 = smov 8   ;;  %s724_s28 = smov [#allocation5]  }
   0x5   :  { %25 = dma.hbm_to_vmem [thread:$0]  %s18_s20, 2048, %s20_s22, [#allocation4], %s722_s26, %s722_s26, %s723_s27  }
   0x6   :  { %s32_s29 = sshll.u32 %s724_s28, 4  ;;  %s33_s29 = int_to_ptr.vmem [resolvable:$true] %s32_s29 }
   0x7   :  { %38 = dma.hbm_to_vmem [thread:$0]  %s31_s25, 2048, %s33_s29, [#allocation6], %s722_s26, %s722_s26, %s723_s27  }
   0x8   :  { %717 = dma.done.wait [#allocation4], 2048  }
   0x9   :  { %718 = vsyncadd [#allocation4], 4294965248 }
   0xa   :  { %719 = dma.done.wait [#allocation6], 2048  }
   0xb   :  { %720 = vsyncadd [#allocation6], 4294965248  ;;  %v84_v0 = vld [vmem:[#allocation5 + $0x78] sm:$0xff]  ;;  %v83_v1 = vld [vmem:[#allocation5 + $0x70] sm:$0xff] }
   0xc   :  { %89 = vmatpush.msra.mxu0 %v84_v0  ;;  %551 = vmatpush.msra.mxu1 %v84_v0  ;;  %v82_v2 = vld [vmem:[#allocation5 + $0x68] sm:$0xff]  ;;  %v81_v3 = vld [vmem:[#allocation5 + $0x60] sm:$0xff]  ;;  %v80_v4 = vld [vmem:[#allocation5 + $0x58] sm:$0xff] }
   0xd   :  { %552 = vmatpush.msra.mxu2 %v84_v0  ;;  %553 = vmatpush.msra.mxu3 %v84_v0  ;;  %v79_v5 = vld [vmem:[#allocation5 + $0x50] sm:$0xff]  ;;  %v78_v6 = vld [vmem:[#allocation5 + $0x48] sm:$0xff]  ;;  %v77_v7 = vld [vmem:[#allocation5 + $0x40] sm:$0xff] }
   0xe   :  { %90 = vmatpush.msra.mxu0 %v83_v1  ;;  %554 = vmatpush.msra.mxu1 %v83_v1  ;;  %v76_v8 = vld [vmem:[#allocation5 + $0x38] sm:$0xff]  ;;  %v75_v9 = vld [vmem:[#allocation5 + $0x30] sm:$0xff]  ;;  %v74_v10 = vld [vmem:[#allocation5 + $0x28] sm:$0xff] }
   0xf   :  { %555 = vmatpush.msra.mxu2 %v83_v1  ;;  %556 = vmatpush.msra.mxu3 %v83_v1  ;;  %v73_v11 = vld [vmem:[#allocation5 + $0x20] sm:$0xff]  ;;  %v72_v12 = vld [vmem:[#allocation5 + $0x18] sm:$0xff]  ;;  %v71_v13 = vld [vmem:[#allocation5 + $0x10] sm:$0xff] }
  0x10   :  { %91 = vmatpush.msra.mxu0 %v82_v2  ;;  %557 = vmatpush.msra.mxu1 %v82_v2  ;;  %v70_v14 = vld [vmem:[#allocation5 + $0x8] sm:$0xff]  ;;  %v69_v15 = vld [vmem:[#allocation5] sm:$0xff]  ;;  %v55_v24 = vld [vmem:[#allocation3 + $0x10] sm:$0xff] }
  0x11   :  { %558 = vmatpush.msra.mxu2 %v82_v2  ;;  %559 = vmatpush.msra.mxu3 %v82_v2  ;;  %v53_v16 = vld [vmem:[#allocation3] sm:$0xff]  ;;  %v54_v20 = vld [vmem:[#allocation3 + $0x8] sm:$0xff]  ;;  %v59_v25 = vld [vmem:[#allocation3 + $0x30] sm:$0xff] }
  0x12   :  { %92 = vmatpush.msra.mxu0 %v81_v3  ;;  %560 = vmatpush.msra.mxu1 %v81_v3  ;;  %v57_v17 = vld [vmem:[#allocation3 + $0x20] sm:$0xff]  ;;  %v58_v21 = vld [vmem:[#allocation3 + $0x28] sm:$0xff]  ;;  %v63_v26 = vld [vmem:[#allocation3 + $0x50] sm:$0xff] }
  0x13   :  { %561 = vmatpush.msra.mxu2 %v81_v3  ;;  %562 = vmatpush.msra.mxu3 %v81_v3  ;;  %v61_v18 = vld [vmem:[#allocation3 + $0x40] sm:$0xff]  ;;  %v62_v22 = vld [vmem:[#allocation3 + $0x48] sm:$0xff]  ;;  %v67_v27 = vld [vmem:[#allocation3 + $0x70] sm:$0xff] }
  0x14   :  { %93 = vmatpush.msra.mxu0 %v80_v4  ;;  %563 = vmatpush.msra.mxu1 %v80_v4  ;;  %v65_v19 = vld [vmem:[#allocation3 + $0x60] sm:$0xff]  ;;  %v66_v23 = vld [vmem:[#allocation3 + $0x68] sm:$0xff]  ;;  %v56_v28 = vld [vmem:[#allocation3 + $0x18] sm:$0xff] }
  0x15   :  { %564 = vmatpush.msra.mxu2 %v80_v4  ;;  %565 = vmatpush.msra.mxu3 %v80_v4  ;;  %v60_v29 = vld [vmem:[#allocation3 + $0x38] sm:$0xff]  ;;  %v764_v32 = vld [vmem:[%s1276_s2] ss:$0 sm:$0xff] }
  0x16   :  { %94 = vmatpush.msra.mxu0 %v79_v5  ;;  %566 = vmatpush.msra.mxu1 %v79_v5  ;;  %v64_v30 = vld [vmem:[#allocation3 + $0x58] sm:$0xff] }
  0x17   :  { %567 = vmatpush.msra.mxu2 %v79_v5  ;;  %568 = vmatpush.msra.mxu3 %v79_v5  ;;  %v68_v31 = vld [vmem:[#allocation3 + $0x78] sm:$0xff] }
  0x18   :  { %95 = vmatpush.msra.mxu0 %v78_v6  ;;  %569 = vmatpush.msra.mxu1 %v78_v6 }
  0x19   :  { %570 = vmatpush.msra.mxu2 %v78_v6  ;;  %571 = vmatpush.msra.mxu3 %v78_v6 }
  0x1a   :  { %96 = vmatpush.msra.mxu0 %v77_v7  ;;  %572 = vmatpush.msra.mxu1 %v77_v7 }
  0x1b   :  { %573 = vmatpush.msra.mxu2 %v77_v7  ;;  %574 = vmatpush.msra.mxu3 %v77_v7 }
  0x1c   :  { %97 = vmatpush.msra.mxu0 %v76_v8  ;;  %575 = vmatpush.msra.mxu1 %v76_v8 }
  0x1d   :  { %576 = vmatpush.msra.mxu2 %v76_v8  ;;  %577 = vmatpush.msra.mxu3 %v76_v8 }
  0x1e   :  { %98 = vmatpush.msra.mxu0 %v75_v9  ;;  %578 = vmatpush.msra.mxu1 %v75_v9 }
  0x1f   :  { %579 = vmatpush.msra.mxu2 %v75_v9  ;;  %580 = vmatpush.msra.mxu3 %v75_v9 }
  0x20   :  { %99 = vmatpush.msra.mxu0 %v74_v10  ;;  %581 = vmatpush.msra.mxu1 %v74_v10 }
  0x21   :  { %582 = vmatpush.msra.mxu2 %v74_v10  ;;  %583 = vmatpush.msra.mxu3 %v74_v10 }
  0x22   :  { %100 = vmatpush.msra.mxu0 %v73_v11  ;;  %584 = vmatpush.msra.mxu1 %v73_v11 }
  0x23   :  { %585 = vmatpush.msra.mxu2 %v73_v11  ;;  %586 = vmatpush.msra.mxu3 %v73_v11 }
  0x24   :  { %101 = vmatpush.msra.mxu0 %v72_v12  ;;  %587 = vmatpush.msra.mxu1 %v72_v12 }
  0x25   :  { %588 = vmatpush.msra.mxu2 %v72_v12  ;;  %589 = vmatpush.msra.mxu3 %v72_v12 }
  0x26   :  { %102 = vmatpush.msra.mxu0 %v71_v13  ;;  %590 = vmatpush.msra.mxu1 %v71_v13 }
  0x27   :  { %591 = vmatpush.msra.mxu2 %v71_v13  ;;  %592 = vmatpush.msra.mxu3 %v71_v13 }
  0x28   :  { %103 = vmatpush.msra.mxu0 %v70_v14  ;;  %593 = vmatpush.msra.mxu1 %v70_v14 }
  0x29   :  { %594 = vmatpush.msra.mxu2 %v70_v14  ;;  %595 = vmatpush.msra.mxu3 %v70_v14 }
  0x2a   :  { %104 = vmatpush.msra.mxu0 %v69_v15  ;;  %596 = vmatpush.msra.mxu1 %v69_v15 }
  0x2b   :  { %597 = vmatpush.msra.mxu2 %v69_v15  ;;  %598 = vmatpush.msra.mxu3 %v69_v15 }
  0x2c   :  { %105 = vmatmul.f32.vlgmr.msra.gmra.mxu0 %v53_v16  ;;  %117 = vmatmul.f32.vlgmr.msra.gmra.mxu1 %v57_v17 }
  0x2d   :  { %129 = vmatmul.f32.vlgmr.msra.gmra.mxu2 %v61_v18  ;;  %141 = vmatmul.f32.vlgmr.msra.gmra.mxu3 %v65_v19 }
  0x34   :  { %108 = vmatmul.f32.gmra.mxu0 %v54_v20  ;;  %120 = vmatmul.f32.gmra.mxu1 %v58_v21 }
  0x35   :  { %132 = vmatmul.f32.gmra.mxu2 %v62_v22  ;;  %144 = vmatmul.f32.gmra.mxu3 %v66_v23 }
  0x3c   :  { %111 = vmatmul.f32.gmra.mxu0 %v55_v24  ;;  %123 = vmatmul.f32.gmra.mxu1 %v59_v25 }
  0x3d   :  { %135 = vmatmul.f32.gmra.mxu2 %v63_v26  ;;  %147 = vmatmul.f32.gmra.mxu3 %v67_v27 }
  0x44   :  { %114 = vmatmul.f32.gmra.mxu0 %v56_v28  ;;  %126 = vmatmul.f32.gmra.mxu1 %v60_v29 }
  0x45   :  { %138 = vmatmul.f32.gmra.mxu2 %v64_v30  ;;  %150 = vmatmul.f32.gmra.mxu3 %v68_v31 }
  0xa9   :  { %v106_v33 = vpop.f32.mrf.mxu0  ;;  %v118_v34 = vpop.f32.mrf.mxu1 }
  0xaa   :  { %v107_v35 = vadd.f32 %v764_v32, %v106_v33  ;;  %v119_v36 = vadd.f32 %v764_v32, %v118_v34 }
  0xac   :  { %v154_v37 = vsub.f32 0.0, %v107_v35  ;;  %v158_v38 = vsub.f32 0.0, %v119_v36 }
  0xae   :  { %v170_v39 = vmul.f32 1.442695, %v154_v37  ;;  %v178_v40 = vmul.f32 1.442695, %v158_v38 }
  0xb0   :  { %605 = vpow2.f32 %v170_v39  ;;  %v130_v41 = vpop.f32.mrf.mxu2  ;;  %v142_v42 = vpop.f32.mrf.mxu3 }
  0xb1   :  { %607 = vpow2.f32 %v178_v40  ;;  %v131_v43 = vadd.f32 %v764_v32, %v130_v41  ;;  %v143_v44 = vadd.f32 %v764_v32, %v142_v42  ;;  %v109_v45 = vpop.f32.mrf.mxu0  ;;  %v121_v46 = vpop.f32.mrf.mxu1 }
  0xb2   :  { %v110_v47 = vadd.f32 %v764_v32, %v109_v45  ;;  %v122_v48 = vadd.f32 %v764_v32, %v121_v46 }
  0xb3   :  { %v162_v49 = vsub.f32 0.0, %v131_v43  ;;  %v166_v50 = vsub.f32 0.0, %v143_v44 }
  0xb4   :  { %v155_v51 = vsub.f32 0.0, %v110_v47  ;;  %v159_v52 = vsub.f32 0.0, %v122_v48 }
  0xb5   :  { %v186_v53 = vmul.f32 1.442695, %v162_v49  ;;  %v194_v54 = vmul.f32 1.442695, %v166_v50 }
  0xb6   :  { %v606_v55 = vpop.eup %605  ;;  %v172_v58 = vmul.f32 1.442695, %v155_v51  ;;  %v180_v60 = vmul.f32 1.442695, %v159_v52 }
  0xb7   :  { %v608_v56 = vpop.eup %607  ;;  %v772_v57 = vadd.f32 1.0, %v606_v55  ;;  %609 = vpow2.f32 %v186_v53 }
  0xb8   :  { %v774_v59 = vadd.f32 1.0, %v608_v56  ;;  %611 = vpow2.f32 %v194_v54  ;;  %v133_v61 = vpop.f32.mrf.mxu2  ;;  %v145_v62 = vpop.f32.mrf.mxu3 }
  0xb9   :  { %613 = vrcp.f32 %v772_v57  ;;  %v134_v63 = vadd.f32 %v764_v32, %v133_v61  ;;  %v112_v0 = vpop.f32.mrf.mxu0  ;;  %v124_v1 = vpop.f32.mrf.mxu1  ;;  %v146_v2 = vadd.f32 %v764_v32, %v145_v62  ;;  %v229_v13 = vand.u32 2147483648, %v772_v57 }
  0xba   :  { %615 = vrcp.f32 %v774_v59  ;;  %v113_v3 = vadd.f32 %v764_v32, %v112_v0  ;;  %v125_v4 = vadd.f32 %v764_v32, %v124_v1  ;;  %v289_v9 = vand.u32 2147483648, %v774_v59 }
  0xbb   :  { %617 = vpow2.f32 %v172_v58  ;;  %v163_v5 = vsub.f32 0.0, %v134_v63  ;;  %v167_v6 = vsub.f32 0.0, %v146_v2  ;;  %v287_v12 = vand.u32 2147483647, %v774_v59 }
  0xbc   :  { %619 = vpow2.f32 %v180_v60  ;;  %v156_v7 = vsub.f32 0.0, %v113_v3  ;;  %v160_v8 = vsub.f32 0.0, %v125_v4  ;;  %vm283_vm0 = vweird.f32 %v774_v59 }
  0xbd   :  { %v610_v10 = vpop.eup %609  ;;  %v188_v11 = vmul.f32 1.442695, %v163_v5  ;;  %v196_v17 = vmul.f32 1.442695, %v167_v6  ;;  %v792_v21 = vor.u32 1.1754944e-38, %v289_v9  ;;  %v800_v27 = vor.u32 1.1754944e-38, %v229_v13 }
  0xbe   :  { %v612_v14 = vpop.eup %611  ;;  %v785_v15 = vadd.f32 1.0, %v610_v10  ;;  %v174_v16 = vmul.f32 1.442695, %v156_v7  ;;  %v182_v20 = vmul.f32 1.442695, %v160_v8  ;;  %vm814_vm2 = vcmp.eq.f32.partialorder %v287_v12, 8.507059e+37 }
  0xbf   :  { %v788_v18 = vpop.eup %613  ;;  %v790_v19 = vadd.f32 1.0, %v612_v14  ;;  %621 = vpow2.f32 %v188_v11  ;;  %v227_v26 = vand.u32 2147483647, %v772_v57  ;;  %vm223_vm3 = vweird.f32 %v772_v57 }
  0xc0   :  { %v794_v22 = vpop.eup %615  ;;  %623 = vrcp.f32 %v785_v15  ;;  %v136_v23 = vpop.f32.mrf.mxu2  ;;  %v219_v25 = vmul.f32 %v788_v18, %v772_v57  ;;  %vm224_vm1 = vweird.f32 %v788_v18  ;;  %vm343_vm6 = vweird.f32 %v785_v15 }
  0xc1   :  { %v148_v24 = vpop.f32.mrf.mxu3  ;;  %v618_v28 = vpop.eup %617  ;;  %625 = vrcp.f32 %v790_v19  ;;  %v137_v29 = vadd.f32 %v764_v32, %v136_v23  ;;  %v279_v34 = vmul.f32 %v794_v22, %v774_v59  ;;  %vm284_vm4 = vweird.f32 %v794_v22  ;;  %v863_v59 = vld [vmem:[%s1277_s3] ss:$0 sm:$0xff]  ;;  %vm225_vm10 = vmor %vm223_vm3, %vm224_vm1 }
  0xc2   :  { %v115_v30 = vpop.f32.mrf.mxu0  ;;  %v127_v31 = vpop.f32.mrf.mxu1  ;;  %v149_v33 = vadd.f32 %v764_v32, %v148_v24  ;;  %v807_v36 = vadd.f32 1.0, %v618_v28  ;;  %627 = vpow2.f32 %v174_v16  ;;  %v220_v55 = vsub.f32 1.0, %v219_v25  ;;  %vm847_vm8 = vmor %vm283_vm0, %vm284_vm4 }
  0xc3   :  { %v620_v35 = vpop.eup %619  ;;  %v116_v37 = vadd.f32 %v764_v32, %v115_v30  ;;  %v128_v38 = vadd.f32 %v764_v32, %v127_v31  ;;  %629 = vpow2.f32 %v182_v20  ;;  %v164_v40 = vsub.f32 0.0, %v137_v29 }
  0xc4   :  { %v812_v39 = vadd.f32 1.0, %v620_v35  ;;  %v168_v41 = vsub.f32 0.0, %v149_v33  ;;  %631 = vrcp.f32 %v807_v36  ;;  %v280_v45 = vsub.f32 1.0, %v279_v34 }
  0xc5   :  { %v157_v43 = vsub.f32 0.0, %v116_v37  ;;  %v161_v44 = vsub.f32 0.0, %v128_v38  ;;  %v622_v46 = vpop.eup %621  ;;  %v190_v47 = vmul.f32 1.442695, %v164_v40  ;;  %vm829_vm5 = vcmp.eq.f32.partialorder %v227_v26, 8.507059e+37 }
  0xc6   :  { %633 = vrcp.f32 %v812_v39  ;;  %v198_v48 = vmul.f32 1.442695, %v168_v41  ;;  %v822_v49 = vpop.eup %623  ;;  %v824_v50 = vadd.f32 1.0, %v622_v46  ;;  %v281_v54 = vmul.f32 %v794_v22, %v280_v45 }
  0xc7   :  { %635 = vpow2.f32 %v196_v17  ;;  %v176_v51 = vmul.f32 1.442695, %v157_v43  ;;  %v184_v52 = vmul.f32 1.442695, %v161_v44  ;;  %v826_v53 = vpop.eup %625  ;;  %v339_v62 = vmul.f32 %v822_v49, %v785_v15 }
  0xc8   :  { %637 = vpow2.f32 %v190_v47  ;;  %v628_v58 = vpop.eup %627  ;;  %v139_v60 = vpop.f32.mrf.mxu2  ;;  %vm344_vm7 = vweird.f32 %v822_v49  ;;  %v347_v63 = vand.u32 2147483647, %v785_v15  ;;  %v282_v7 = vadd.f32 %v794_v22, %v281_v54 }
  0xc9   :  { %639 = vrcp.f32 %v824_v50  ;;  %v151_v61 = vpop.f32.mrf.mxu3  ;;  %v630_v0 = vpop.eup %629  ;;  %v839_v1 = vadd.f32 1.0, %v628_v58  ;;  %v140_v2 = vadd.f32 %v764_v32, %v139_v60  ;;  %v221_v8 = vmul.f32 %v788_v18, %v220_v55  ;;  %vm345_vm11 = vmor %vm343_vm6, %vm344_vm7 }
  0xca   :  { %641 = vpow2.f32 %v176_v51  ;;  %v152_v3 = vadd.f32 %v764_v32, %v151_v61  ;;  %v851_v5 = vpop.eup %631  ;;  %v853_v6 = vadd.f32 1.0, %v630_v0  ;;  %v340_v11 = vsub.f32 1.0, %v339_v62 }
  0xcb   :  { %643 = vpow2.f32 %v184_v52  ;;  %v165_v32 = vsub.f32 0.0, %v140_v2  ;;  %v286_v13 = vsel %vm847_vm8, %v794_v22, %v282_v7  ;;  %v222_v14 = vadd.f32 %v788_v18, %v221_v8 }
  0xcc   :  { %v857_v9 = vpop.eup %633  ;;  %645 = vrcp.f32 %v839_v1  ;;  %v169_v10 = vsub.f32 0.0, %v152_v3  ;;  %vm870_vm9 = vcmp.eq.f32.partialorder %v347_v63, 8.507059e+37  ;;  %v291_v26 = vsel %vm814_vm2, %v792_v21, %v286_v13 }
  0xcd   :  { %v636_v12 = vpop.eup %635  ;;  %647 = vrcp.f32 %v853_v6  ;;  %v192_v23 = vmul.f32 1.442695, %v165_v32  ;;  %v226_v28 = vsel %vm225_vm10, %v788_v18, %v222_v14  ;;  %v341_v29 = vmul.f32 %v822_v49, %v340_v11 }
  0xce   :  { %v638_v17 = vpop.eup %637  ;;  %v874_v20 = vadd.f32 1.0, %v636_v12  ;;  %649 = vpow2.f32 %v198_v48  ;;  %v200_v24 = vmul.f32 1.442695, %v169_v10  ;;  %v466_v31 = vmul.f32 %v863_v59, %v291_v26 }
  0xcf   :  { %v880_v25 = vpop.eup %639  ;;  %v882_v22 = vadd.f32 1.0, %v638_v17  ;;  %v231_v57 = vsel %vm829_vm5, %v800_v27, %v226_v28  ;;  %v349_v33 = vand.u32 2147483648, %v785_v15  ;;  %v342_v21 = vadd.f32 %v822_v49, %v341_v29 }
  0xd0   :  { %v642_v30 = vpop.eup %641  ;;  %651 = vrcp.f32 %v874_v20  ;;  %v462_v18 = vmul.f32 %v863_v59, %v231_v57  ;;  %486 = vadd.xlane.f32.xlu2 %v466_v31  ;;  %v399_v40 = vmul.f32 %v826_v53, %v790_v19  ;;  %vm403_vm12 = vweird.f32 %v790_v19 }
  0xd1   :  { %v644_v34 = vpop.eup %643  ;;  %653 = vrcp.f32 %v882_v22  ;;  %v896_v35 = vadd.f32 1.0, %v642_v30  ;;  %v350_v27 = vor.u32 1.1754944e-38, %v349_v33  ;;  %v346_v42 = vsel %vm345_vm11, %v822_v49, %v342_v21 }
  0xd2   :  { %v900_v37 = vpop.eup %645  ;;  %v902_v38 = vadd.f32 1.0, %v644_v34  ;;  %655 = vpow2.f32 %v192_v23  ;;  %478 = vadd.xlane.f32.xlu0 %v462_v18  ;;  %vm404_vm13 = vweird.f32 %v826_v53  ;;  %v400_v44 = vsub.f32 1.0, %v399_v40 }
  0xd3   :  { %v910_v41 = vpop.eup %647  ;;  %657 = vrcp.f32 %v896_v35  ;;  %v351_v15 = vsel %vm870_vm9, %v350_v27, %v346_v42  ;;  %v407_v45 = vand.u32 2147483647, %v790_v19  ;;  %v409_v48 = vand.u32 2147483648, %v790_v19  ;;  %vm405_vm1 = vmor %vm403_vm12, %vm404_vm13 }
  0xd4   :  { %v650_v43 = vpop.eup %649  ;;  %659 = vrcp.f32 %v902_v38  ;;  %v470_v47 = vmul.f32 %v863_v59, %v351_v15  ;;  %v401_v51 = vmul.f32 %v826_v53, %v400_v44  ;;  %v294_v54 = vmul.f32 %v857_v9, %v812_v39 }
  0xd5   :  { %v920_v46 = vadd.f32 1.0, %v650_v43  ;;  %661 = vpow2.f32 %v200_v24  ;;  %vm927_vm14 = vcmp.eq.f32.partialorder %v407_v45, 8.507059e+37  ;;  %vm298_vm15 = vweird.f32 %v812_v39 }
  0xd6   :  { %v924_v49 = vpop.eup %651  ;;  %v410_v56 = vor.u32 1.1754944e-38, %v409_v48  ;;  %vm299_vm0 = vweird.f32 %v857_v9  ;;  %v302_v58 = vand.u32 2147483647, %v812_v39  ;;  %v402_v61 = vadd.f32 %v826_v53, %v401_v51 }
  0xd7   :  { %v934_v55 = vpop.eup %653  ;;  %663 = vrcp.f32 %v920_v46  ;;  %v295_v62 = vsub.f32 1.0, %v294_v54  ;;  %v304_v63 = vand.u32 2147483648, %v812_v39  ;;  %v249_v0 = vmul.f32 %v900_v37, %v839_v1  ;;  %vm968_vm5 = vmor %vm298_vm15, %vm299_vm0 }
  0xd8   :  { %v656_v60 = vpop.eup %655  ;;  %vm951_vm2 = vcmp.eq.f32.partialorder %v302_v58, 8.507059e+37  ;;  %vm253_vm3 = vweird.f32 %v839_v1  ;;  %vm254_vm4 = vweird.f32 %v900_v37  ;;  %494 = vadd.xlane.f32.xlu2 %v470_v47  ;;  %v406_v8 = vsel %vm405_vm1, %v826_v53, %v402_v61 }
  0xd9   :  { %v943_v2 = vpop.eup %657  ;;  %v945_v3 = vadd.f32 1.0, %v656_v60  ;;  %v296_v32 = vmul.f32 %v857_v9, %v295_v62  ;;  %v305_v10 = vor.u32 1.1754944e-38, %v304_v63  ;;  %v250_v11 = vsub.f32 1.0, %v249_v0  ;;  %vm255_vm9 = vmor %vm253_vm3, %vm254_vm4 }
  0xda   :  { %v957_v7 = vpop.eup %659  ;;  %v411_v19 = vsel %vm927_vm14, %v410_v56, %v406_v8  ;;  %v257_v53 = vand.u32 2147483647, %v839_v1  ;;  %v259_v14 = vand.u32 2147483648, %v839_v1  ;;  %v234_v29 = vmul.f32 %v851_v5, %v807_v36 }
  0xdb   :  { %v662_v12 = vpop.eup %661  ;;  %665 = vrcp.f32 %v945_v3  ;;  %v474_v17 = vmul.f32 %v863_v59, %v411_v19  ;;  %v297_v23 = vadd.f32 %v857_v9, %v296_v32  ;;  %v251_v24 = vmul.f32 %v900_v37, %v250_v11 }
  0xdc   :  { %v974_v16 = vadd.f32 1.0, %v662_v12  ;;  %vm981_vm6 = vcmp.eq.f32.partialorder %v257_v53, 8.507059e+37  ;;  %v260_v28 = vor.u32 1.1754944e-38, %v259_v14  ;;  %vm238_vm7 = vweird.f32 %v807_v36 }
  0xdd   :  { %v979_v26 = vpop.eup %663  ;;  %502 = vadd.xlane.f32.xlu0 %v474_v17  ;;  %v301_v30 = vsel %vm968_vm5, %v857_v9, %v297_v23  ;;  %v252_v31 = vadd.f32 %v900_v37, %v251_v24  ;;  %vm239_vm8 = vweird.f32 %v851_v5  ;;  %v235_v33 = vsub.f32 1.0, %v234_v29 }
  0xde   :  { %667 = vrcp.f32 %v974_v16  ;;  %v306_v57 = vsel %vm951_vm2, %v305_v10, %v301_v30  ;;  %v242_v34 = vand.u32 2147483647, %v807_v36  ;;  %v244_v18 = vand.u32 2147483648, %v807_v36  ;;  %vm240_vm14 = vmor %vm238_vm7, %vm239_vm8 }
  0xdf   :  { %v467_v21 = vmul.f32 %v863_v59, %v306_v57  ;;  %v256_v9 = vsel %vm255_vm9, %v900_v37, %v252_v31  ;;  %v369_v27 = vmul.f32 %v934_v55, %v882_v22  ;;  %vm373_vm10 = vweird.f32 %v882_v22 }
  0xe0   :  { %v261_v1 = vsel %vm981_vm6, %v260_v28, %v256_v9  ;;  %v236_v42 = vmul.f32 %v851_v5, %v235_v33  ;;  %vm1012_vm11 = vcmp.eq.f32.partialorder %v242_v34, 8.507059e+37  ;;  %v245_v15 = vor.u32 1.1754944e-38, %v244_v18 }
  0xe1   :  { %v1007_v40 = vpop.eup %665  ;;  %488 = vadd.xlane.f32.xlu2 %v467_v21  ;;  %v464_v37 = vmul.f32 %v863_v59, %v261_v1  ;;  %v370_v44 = vsub.f32 1.0, %v369_v27  ;;  %vm374_vm12 = vweird.f32 %v934_v55  ;;  %v377_v45 = vand.u32 2147483647, %v882_v22 }
  0xe2   :  { %v237_v47 = vadd.f32 %v851_v5, %v236_v42  ;;  %v379_v48 = vand.u32 2147483648, %v882_v22  ;;  %v354_v51 = vmul.f32 %v880_v25, %v824_v50  ;;  %vm358_vm13 = vweird.f32 %v824_v50  ;;  %vm375_vm2 = vmor %vm373_vm10, %vm374_vm12 }
  0xe3   :  { %482 = vadd.xlane.f32.xlu1 %v464_v37  ;;  %v371_v54 = vmul.f32 %v934_v55, %v370_v44  ;;  %vm1031_vm15 = vcmp.eq.f32.partialorder %v377_v45, 8.507059e+37  ;;  %vm359_vm0 = vweird.f32 %v880_v25  ;;  %v362_v58 = vand.u32 2147483647, %v824_v50 }
  0xe4   :  { %v1024_v52 = vpop.eup %667  ;;  %v241_v60 = vsel %vm240_vm14, %v851_v5, %v237_v47  ;;  %v380_v61 = vor.u32 1.1754944e-38, %v379_v48  ;;  %v355_v62 = vsub.f32 1.0, %v354_v51  ;;  %v364_v63 = vand.u32 2147483648, %v824_v50  ;;  %vm360_vm5 = vmor %vm358_vm13, %vm359_vm0 }
  0xe5   :  { %v246_v36 = vsel %vm1012_vm11, %v245_v15, %v241_v60  ;;  %v372_v0 = vadd.f32 %v934_v55, %v371_v54  ;;  %vm1042_vm1 = vcmp.eq.f32.partialorder %v362_v58, 8.507059e+37  ;;  %v384_v8 = vmul.f32 %v1007_v40, %v945_v3 }
  0xe6   :  { %v463_v32 = vmul.f32 %v863_v59, %v246_v36  ;;  %v356_v5 = vmul.f32 %v880_v25, %v355_v62  ;;  %v365_v10 = vor.u32 1.1754944e-38, %v364_v63  ;;  %vm388_vm3 = vweird.f32 %v945_v3 }
  0xe7   :  { %v376_v11 = vsel %vm375_vm2, %v934_v55, %v372_v0  ;;  %v385_v12 = vsub.f32 1.0, %v384_v8  ;;  %vm389_vm4 = vweird.f32 %v1007_v40  ;;  %v392_v19 = vand.u32 2147483647, %v945_v3 }
  0xe8   :  { %480 = vadd.xlane.f32.xlu0 %v463_v32  ;;  %v381_v13 = vsel %vm1031_vm15, %v380_v61, %v376_v11  ;;  %v357_v53 = vadd.f32 %v880_v25, %v356_v5  ;;  %v394_v22 = vand.u32 2147483648, %v945_v3  ;;  %v264_v14 = vmul.f32 %v943_v2, %v896_v35  ;;  %vm390_vm9 = vmor %vm388_vm3, %vm389_vm4 }
  0xe9   :  { %v472_v17 = vmul.f32 %v863_v59, %v381_v13  ;;  %v386_v55 = vmul.f32 %v1007_v40, %v385_v12  ;;  %vm1070_vm6 = vcmp.eq.f32.partialorder %v392_v19, 8.507059e+37  ;;  %vm268_vm7 = vweird.f32 %v896_v35 }
  0xea   :  { %v361_v24 = vsel %vm360_vm5, %v880_v25, %v357_v53  ;;  %v395_v39 = vor.u32 1.1754944e-38, %v394_v22  ;;  %v265_v28 = vsub.f32 1.0, %v264_v14  ;;  %vm269_vm8 = vweird.f32 %v943_v2 }
  0xeb   :  { %498 = vadd.xlane.f32.xlu1 %v472_v17  ;;  %v366_v29 = vsel %vm1042_vm1, %v365_v10, %v361_v24  ;;  %v387_v50 = vadd.f32 %v1007_v40, %v386_v55  ;;  %v272_v30 = vand.u32 2147483647, %v896_v35  ;;  %v274_v31 = vand.u32 2147483648, %v896_v35  ;;  %vm270_vm13 = vmor %vm268_vm7, %vm269_vm8 }
  0xec   :  { %v471_v57 = vmul.f32 %v863_v59, %v366_v29  ;;  %v266_v25 = vmul.f32 %v943_v2, %v265_v28  ;;  %v309_v33 = vmul.f32 %v910_v41, %v853_v6  ;;  %vm313_vm10 = vweird.f32 %v853_v6 }
  0xed   :  { %v391_v34 = vsel %vm390_vm9, %v1007_v40, %v387_v50  ;;  %vm1092_vm11 = vcmp.eq.f32.partialorder %v272_v30, 8.507059e+37  ;;  %v275_v21 = vor.u32 1.1754944e-38, %v274_v31  ;;  %vm314_vm12 = vweird.f32 %v910_v41 }
  0xee   :  { %v396_v3 = vsel %vm1070_vm6, %v395_v39, %v391_v34  ;;  %v267_v9 = vadd.f32 %v943_v2, %v266_v25  ;;  %v310_v27 = vsub.f32 1.0, %v309_v33  ;;  %v317_v1 = vand.u32 2147483647, %v853_v6  ;;  %vm1123_vm1 = vmor %vm313_vm10, %vm314_vm12 }
  0xef   :  { %v473_v42 = vmul.f32 %v863_v59, %v396_v3  ;;  %v319_v40 = vand.u32 2147483648, %v853_v6  ;;  %v429_v43 = vmul.f32 %v979_v26, %v920_v46  ;;  %vm433_vm14 = vweird.f32 %v920_v46 }
  0xf0   :  { %496 = vadd.xlane.f32.xlu0 %v471_v57  ;;  %v271_v15 = vsel %vm270_vm13, %v943_v2, %v267_v9  ;;  %v311_v37 = vmul.f32 %v910_v41, %v310_v27  ;;  %vm1112_vm15 = vcmp.eq.f32.partialorder %v317_v1, 8.507059e+37  ;;  %vm434_vm0 = vweird.f32 %v979_v26 }
  0xf1   :  { %500 = vadd.xlane.f32.xlu2 %v473_v42  ;;  %v276_v35 = vsel %vm1092_vm11, %v275_v21, %v271_v15  ;;  %v320_v2 = vor.u32 1.1754944e-38, %v319_v40  ;;  %v430_v47 = vsub.f32 1.0, %v429_v43  ;;  %v437_v48 = vand.u32 2147483647, %v920_v46  ;;  %vm1147_vm5 = vmor %vm433_vm14, %vm434_vm0 }
  0xf2   :  { %v465_v51 = vmul.f32 %v863_v59, %v276_v35  ;;  %v312_v54 = vadd.f32 %v910_v41, %v311_v37  ;;  %v439_v56 = vand.u32 2147483648, %v920_v46  ;;  %v324_v58 = vmul.f32 %v957_v7, %v902_v38 }
  0xf3   :  { %v431_v60 = vmul.f32 %v979_v26, %v430_v47  ;;  %vm1134_vm2 = vcmp.eq.f32.partialorder %v437_v48, 8.507059e+37  ;;  %vm328_vm3 = vweird.f32 %v902_v38  ;;  %vm329_vm4 = vweird.f32 %v957_v7 }
  0xf4   :  { %484 = vadd.xlane.f32.xlu1 %v465_v51  ;;  %v316_v61 = vsel %vm1123_vm1, %v910_v41, %v312_v54  ;;  %v440_v63 = vor.u32 1.1754944e-38, %v439_v56  ;;  %v325_v36 = vsub.f32 1.0, %v324_v58  ;;  %v332_v0 = vand.u32 2147483647, %v902_v38  ;;  %vm1172_vm8 = vmor %vm328_vm3, %vm329_vm4 }
  0xf5   :  { %v321_v4 = vsel %vm1112_vm15, %v320_v2, %v316_v61  ;;  %v432_v8 = vadd.f32 %v979_v26, %v431_v60  ;;  %v334_v32 = vand.u32 2147483648, %v902_v38  ;;  %v444_v41 = vmul.f32 %v1024_v52, %v974_v16 }
  0xf6   :  { %v468_v46 = vmul.f32 %v863_v59, %v321_v4  ;;  %v326_v5 = vmul.f32 %v957_v7, %v325_v36  ;;  %vm1160_vm6 = vcmp.eq.f32.partialorder %v332_v0, 8.507059e+37  ;;  %vm448_vm7 = vweird.f32 %v974_v16 }
  0xf7   :  { %v436_v11 = vsel %vm1147_vm5, %v979_v26, %v432_v8  ;;  %v335_v19 = vor.u32 1.1754944e-38, %v334_v32  ;;  %v445_v13 = vsub.f32 1.0, %v444_v41  ;;  %vm449_vm9 = vweird.f32 %v1024_v52 }
  0xf8   :  { %490 = vadd.xlane.f32.xlu0 %v468_v46  ;;  %v441_v53 = vsel %vm1134_vm2, %v440_v63, %v436_v11  ;;  %v327_v22 = vadd.f32 %v957_v7, %v326_v5  ;;  %v452_v26 = vand.u32 2147483647, %v974_v16  ;;  %v454_v14 = vand.u32 2147483648, %v974_v16  ;;  %vm450_vm11 = vmor %vm448_vm7, %vm449_vm9 }
  0xf9   :  { %v476_v38 = vmul.f32 %v863_v59, %v441_v53  ;;  %v446_v17 = vmul.f32 %v1024_v52, %v445_v13  ;;  %v414_v55 = vmul.f32 %v924_v49, %v874_v20  ;;  %vm418_vm10 = vweird.f32 %v874_v20 }
  0xfa   :  { %v331_v23 = vsel %vm1172_vm8, %v957_v7, %v327_v22  ;;  %vm453_vm12 = vcmp.eq.f32.partialorder %v452_v26, 8.507059e+37  ;;  %v455_v24 = vor.u32 1.1754944e-38, %v454_v14  ;;  %vm419_vm13 = vweird.f32 %v924_v49 }
  0xfb   :  { %506 = vadd.xlane.f32.xlu2 %v476_v38  ;;  %v336_v39 = vsel %vm1160_vm6, %v335_v19, %v331_v23  ;;  %v447_v28 = vadd.f32 %v1024_v52, %v446_v17  ;;  %v415_v29 = vsub.f32 1.0, %v414_v55  ;;  %v422_v50 = vand.u32 2147483647, %v874_v20  ;;  %vm420_vm14 = vmor %vm418_vm10, %vm419_vm13 }
  0xfc   :  { %v469_v30 = vmul.f32 %v863_v59, %v336_v39  ;;  %v424_v7 = vand.u32 2147483648, %v874_v20  ;;  %vm528_vm0 = vcmask 7168  }
  0xfd   :  { %v451_v16 = vsel %vm450_vm11, %v1024_v52, %v447_v28  ;;  %v416_v31 = vmul.f32 %v924_v49, %v415_v29  ;;  %vm423_vm15 = vcmp.eq.f32.partialorder %v422_v50, 8.507059e+37  ;;  %v511_v52 = vstv %s1278_s4 }
  0xfe   :  { %492 = vadd.xlane.f32.xlu1 %v469_v30  ;;  %v456_v57 = vsel %vm453_vm12, %v455_v24, %v451_v16  ;;  %v425_v25 = vor.u32 1.1754944e-38, %v424_v7 }
  0xff   :  { %v477_v33 = vmul.f32 %v863_v59, %v456_v57  ;;  %v417_v34 = vadd.f32 %v924_v49, %v416_v31 }
 0x101   :  { %508 = vadd.xlane.f32.xlu0 %v477_v33  ;;  %v421_v18 = vsel %vm420_vm14, %v924_v49, %v417_v34 }
 0x102   :  { %v426_v21 = vsel %vm423_vm15, %v425_v25, %v421_v18 }
 0x103   :  { %v475_v3 = vmul.f32 %v863_v59, %v426_v21 }
 0x106   :  { %504 = vadd.xlane.f32.xlu1 %v475_v3 }
 0x143   :  { %v487_v9 = vpop.xlane.xlu2 %486 }
 0x144   :  { %v516_v20 = vadd.f32 %v511_v52, %v487_v9 }
 0x145   :  { %v479_v27 = vpop.xlane.xlu0 %478 }
 0x146   :  { %v512_v1 = vadd.f32 %v511_v52, %v479_v27  ;;  %533 = vst.msk [vmem:[%s1279_s5 + $0x20] sm:$0xff] %vm528_vm0, %v516_v20 }
 0x148   :  { %529 = vst.msk [vmem:[%s1279_s5] sm:$0xff] %vm528_vm0, %v512_v1 }
 0x14b   :  { %v495_v59 = vpop.xlane.xlu2 %494 }
 0x14c   :  { %v520_v49 = vadd.f32 %v511_v52, %v495_v59 }
 0x14e   :  { %537 = vst.msk [vmem:[%s1279_s5 + $0x40] sm:$0xff] %vm528_vm0, %v520_v49 }
 0x150   :  { %v503_v42 = vpop.xlane.xlu0 %502 }
 0x151   :  { %v524_v40 = vadd.f32 %v511_v52, %v503_v42 }
 0x153   :  { %541 = vst.msk [vmem:[%s1279_s5 + $0x60] sm:$0xff] %vm528_vm0, %v524_v40 }
 0x154   :  { %v489_v43 = vpop.xlane.xlu2 %488 }
 0x155   :  { %v517_v15 = vadd.f32 %v511_v52, %v489_v43 }
 0x156   :  { %v483_v37 = vpop.xlane.xlu1 %482 }
 0x157   :  { %534 = vst.msk [vmem:[%s1279_s5 + $0x28] sm:$0xff] %vm528_vm0, %v517_v15  ;;  %v514_v44 = vadd.f32 %v511_v52, %v483_v37 }
 0x159   :  { %531 = vst.msk [vmem:[%s1279_s5 + $0x10] sm:$0xff] %vm528_vm0, %v514_v44 }
 0x15b   :  { %v481_v35 = vpop.xlane.xlu0 %480 }
 0x15c   :  { %v513_v45 = vadd.f32 %v511_v52, %v481_v35 }
 0x15e   :  { %530 = vst.msk [vmem:[%s1279_s5 + $0x8] sm:$0xff] %vm528_vm0, %v513_v45  ;;  %v499_v2 = vpop.xlane.xlu1 %498 }
 0x15f   :  { %v522_v47 = vadd.f32 %v511_v52, %v499_v2 }
 0x161   :  { %539 = vst.msk [vmem:[%s1279_s5 + $0x50] sm:$0xff] %vm528_vm0, %v522_v47 }
 0x163   :  { %v497_v48 = vpop.xlane.xlu0 %496 }
 0x164   :  { %v521_v51 = vadd.f32 %v511_v52, %v497_v48  ;;  %v501_v54 = vpop.xlane.xlu2 %500 }
 0x165   :  { %v523_v56 = vadd.f32 %v511_v52, %v501_v54 }
 0x166   :  { %538 = vst.msk [vmem:[%s1279_s5 + $0x48] sm:$0xff] %vm528_vm0, %v521_v51 }
 0x167   :  { %540 = vst.msk [vmem:[%s1279_s5 + $0x58] sm:$0xff] %vm528_vm0, %v523_v56  ;;  %v485_v58 = vpop.xlane.xlu1 %484 }
 0x168   :  { %v515_v60 = vadd.f32 %v511_v52, %v485_v58 }
 0x16a   :  { %532 = vst.msk [vmem:[%s1279_s5 + $0x18] sm:$0xff] %vm528_vm0, %v515_v60 }
 0x16b   :  { %v491_v6 = vpop.xlane.xlu0 %490 }
 0x16c   :  { %v518_v61 = vadd.f32 %v511_v52, %v491_v6 }
 0x16e   :  { %535 = vst.msk [vmem:[%s1279_s5 + $0x30] sm:$0xff] %vm528_vm0, %v518_v61  ;;  %v507_v62 = vpop.xlane.xlu2 %506 }
 0x16f   :  { %v526_v63 = vadd.f32 %v511_v52, %v507_v62 }
 0x171   :  { %543 = vst.msk [vmem:[%s1279_s5 + $0x70] sm:$0xff] %vm528_vm0, %v526_v63  ;;  %v493_v36 = vpop.xlane.xlu1 %492 }
 0x172   :  { %v519_v0 = vadd.f32 %v511_v52, %v493_v36 }
 0x174   :  { %536 = vst.msk [vmem:[%s1279_s5 + $0x38] sm:$0xff] %vm528_vm0, %v519_v0  ;;  %v509_v4 = vpop.xlane.xlu0 %508 }
 0x175   :  { %v527_v8 = vadd.f32 %v511_v52, %v509_v4 }
 0x177   :  { %544 = vst.msk [vmem:[%s1279_s5 + $0x78] sm:$0xff] %vm528_vm0, %v527_v8 }
 0x179   :  { %v505_v32 = vpop.xlane.xlu1 %504 }
 0x17a   :  { %v525_v41 = vadd.f32 %v511_v52, %v505_v32 }
 0x17c   :  { %542 = vst.msk [vmem:[%s1279_s5 + $0x68] sm:$0xff] %vm528_vm0, %v525_v41 }
 0x17d   :  { %549 = vsyncpa [#allocation4], 1 }
 0x17e   :  { %550 = vsyncpa [#allocation6], 1 }

</bundles_post_ra>
